<compile_context>
chip_gen: v7x
topology: tpu7x:2x2x1
jax: 0.10.0
libtpu: 0.0.40
codegen_flags: <defaults>
</compile_context>

<pallas_src>
import math

import jax
import jax.numpy as jnp
from jax.experimental import pallas as pl
from jax.experimental.pallas import tpu as pltpu


# --------------------------------------------------------------------------- #
# Kernels
# --------------------------------------------------------------------------- #
def _synth_kernel_folded(p_ref, wt_ref, b_ref, xf_ref, of_ref, v_ref):
    """Batch folded into lanes (used when D is not a multiple of 128).

    p_ref  : (L, L)      softmax(attention), grid-invariant
    wt_ref : (D, D)      value_fc weight transposed (value = x @ wt)
    b_ref  : (1, bt*D)   bias tiled across the bt lane blocks, f32
    xf_ref : (L, bt*D)   bt batch elements, batch folded into lanes
    of_ref : (L, bt*D)   output, same folded layout (lane-dense store)
    v_ref  : VMEM (L, bt*D) scratch for the value intermediate
    """
    D = wt_ref.shape[0]
    bt = xf_ref.shape[1] // D
    op_dt = wt_ref.dtype
    wt = wt_ref[...]

    # value_fc per batch element: per-chunk ref loads, stores into VMEM scratch
    # (bounds live ranges; no concat / vreg pressure).
    for t in range(bt):
        x_t = xf_ref[:, t * D:(t + 1) * D]                        # (L, D)
        v_t = jnp.dot(x_t.astype(op_dt), wt,
                      preferred_element_type=jnp.float32)
        v_ref[:, t * D:(t + 1) * D] = v_t.astype(v_ref.dtype)

    # One lane-dense attention matmul covering all bt elements; bias added once
    # to the f32 accumulator (valid because softmax rows sum to 1).
    out = jnp.dot(p_ref[...], v_ref[...], preferred_element_type=jnp.float32)
    out = out + b_ref[...]
    of_ref[...] = out.astype(of_ref.dtype)


def _synth_kernel_unfolded(p_ref, wt_ref, b_ref, x_ref, o_ref, v_ref):
    """Native (B, L, D) layout (D % 128 == 0): no wrapper transposes.

    x_ref / o_ref : (bt, L, D)
    v_ref         : VMEM (bt*L, D) scratch for the value intermediate
    """
    bt, L, D = x_ref.shape
    op_dt = wt_ref.dtype

    # One MXU matmul for the whole tile: batch folded into sublanes
    # (free reshape when L % 8 == 0). Bias added once, in f32.
    xv = x_ref[...].astype(op_dt).reshape(bt * L, D)
    v = jnp.dot(xv, wt_ref[...], preferred_element_type=jnp.float32)
    v = v + b_ref[...]                                            # (1, D) f32
    v_ref[...] = v.astype(v_ref.dtype)

    p = p_ref[...]
    for t in range(bt):
        v_t = v_ref[t * L:(t + 1) * L, :]                         # (L, D)
        o_ref[t] = jnp.dot(p, v_t,
                           preferred_element_type=jnp.float32).astype(o_ref.dtype)


# --------------------------------------------------------------------------- #
# Tiling / VMEM helpers
# --------------------------------------------------------------------------- #
def _vmem_budget():
    """Generation-aware VMEM budget (bytes): ~75% of physical, capped at 96 MiB."""
    try:
        physical = int(pltpu.get_tpu_info().vmem_capacity_bytes)
    except Exception:
        physical = 64 * 1024 * 1024  # conservative default (v7x-sized)
    return min(physical * 3 // 4, 96 * 1024 * 1024)


def _vmem_needed(bt, L, D, itemsize):
    """Rough per-step VMEM estimate for a batch tile of bt elements."""
    tile = bt * L * D
    need = 2 * tile * itemsize                      # x tile, double-buffered
    need += 2 * tile * itemsize                     # out tile, double-buffered
    need += tile * itemsize                         # value VMEM scratch
    need += (L * L + D * D + bt * D) * itemsize     # grid-invariant blocks
    need += 2 * tile * 4                            # f32 accumulators / temps
    return need


def _choose_bt(B, L, D, itemsize, budget, lane_folded):
    """Largest batch tile that fits VMEM; prefers >= 2 grid steps (v7x megacore).

    In the lane-folded layout the folded lane width bt*D must be 128-aligned
    (or bt == B, i.e. the full array extent) to satisfy the (8, 128) BlockSpec
    tiling rule.
    """
    def aligned(bt):
        return (not lane_folded) or bt == B or (bt * D) % 128 == 0

    cands = [bt for bt in range(1, B + 1) if B % bt == 0 and aligned(bt)]
    fitting = [bt for bt in cands if _vmem_needed(bt, L, D, itemsize) <= budget]
    if fitting:
        split = [bt for bt in fitting if B // bt >= 2]
        return max(split) if split else max(fitting)
    # Nothing fits the budget: use the smallest layout-valid tile.
    # TODO(synk): pad B (or mask a ragged last tile) so unaligned smaller splits
    # become usable; also tile the L contraction for very large L on v7x.
    return min(cands)


def _const_spec(shape, single_buffer):
    """BlockSpec for a grid-invariant block; single-buffered when supported."""
    index_map = lambda *_: (0,) * len(shape)
    if single_buffer and hasattr(pl, "Buffered"):
        return pl.BlockSpec(shape, index_map, pipeline_mode=pl.Buffered(1))
    return pl.BlockSpec(shape, index_map)


# --------------------------------------------------------------------------- #
# Wrapper
# --------------------------------------------------------------------------- #
def synthesizer_random(x, attention, w, b, matmul_dtype=None):
    """SynthesizerRandom forward.

    x: (B, L, D); attention: (1, L, L); w: (D, D) nn.Linear weight; b: (D,).
    matmul_dtype: optional lower-precision dtype (e.g. jnp.bfloat16) for the MXU
      operands (p, W^T, value); accumulation stays f32. Mainly useful on v5e
      where this op can be MXU-bound. Default: keep the input dtype.
    """
    B, L, D = x.shape
    out_dtype = x.dtype
    op_dtype = jnp.dtype(matmul_dtype) if matmul_dtype is not None else x.dtype

    # Hoisted one-time preprocessing shared across the whole grid.
    p = jax.nn.softmax(attention[0].astype(jnp.float32), axis=-1).astype(op_dtype)
    wt = jnp.transpose(w).astype(op_dtype)            # value = x @ W^T == x @ wt
    b32 = b.astype(jnp.float32).reshape(1, D)

    budget = _vmem_budget()
    itemsize = max(x.dtype.itemsize, jnp.dtype(op_dtype).itemsize)
    lane_folded = (D % 128 != 0)
    bt = _choose_bt(B, L, D, itemsize, budget, lane_folded)
    grid = (B // bt,)

    flops = 2 * B * L * D * D + 2 * B * L * L * D
    bytes_accessed = (2 * B * L * D + L * L + D * D + D) * x.dtype.itemsize
    cost = pl.CostEstimate(flops=flops, transcendentals=0,
                           bytes_accessed=bytes_accessed)

    def make_compiler_params():
        return pltpu.CompilerParams(dimension_semantics=("parallel",),
                                    vmem_limit_bytes=budget)

    if not lane_folded:
        # Native (B, L, D) layout: no wrapper transposes.
        def build(single_buffer):
            return pl.pallas_call(
                _synth_kernel_unfolded,
                out_shape=jax.ShapeDtypeStruct((B, L, D), out_dtype),
                grid_spec=pltpu.PrefetchScalarGridSpec(
                    num_scalar_prefetch=0,
                    grid=grid,
                    in_specs=[
                        _const_spec((L, L), single_buffer),        # softmax(attn)
                        _const_spec((D, D), single_buffer),        # W^T
                        _const_spec((1, D), single_buffer),        # bias (f32)
                        pl.BlockSpec((bt, L, D), lambda j: (j, 0, 0)),
                    ],
                    out_specs=pl.BlockSpec((bt, L, D), lambda j: (j, 0, 0)),
                    scratch_shapes=[pltpu.VMEM((bt * L, D), op_dtype)],
                ),
                compiler_params=make_compiler_params(),
                cost_estimate=cost,
            )
        args = (p, wt, b32, x)
        post = lambda o: o
    else:
        # Lane-folded layout for D not 128-aligned (typical D < 128): keeps the
        # attention matmul and the output store lane-dense at the cost of a
        # fold/unfold transpose in the wrapper.
        x_f = jnp.transpose(x, (1, 0, 2)).reshape(L, B * D)
        b_tile = jnp.tile(b32, (1, bt))                            # (1, bt*D) f32

        def build(single_buffer):
            return pl.pallas_call(
                _synth_kernel_folded,
                out_shape=jax.ShapeDtypeStruct((L, B * D), out_dtype),
                grid_spec=pltpu.PrefetchScalarGridSpec(
                    num_scalar_prefetch=0,
                    grid=grid,
                    in_specs=[
                        _const_spec((L, L), single_buffer),        # softmax(attn)
                        _const_spec((D, D), single_buffer),        # W^T
                        _const_spec((1, bt * D), single_buffer),   # tiled bias
                        pl.BlockSpec((L, bt * D), lambda j: (0, j)),
                    ],
                    out_specs=pl.BlockSpec((L, bt * D), lambda j: (0, j)),
                    scratch_shapes=[pltpu.VMEM((L, bt * D), op_dtype)],
                ),
                compiler_params=make_compiler_params(),
                cost_estimate=cost,
            )
        args = (p, wt, b_tile, x_f)
        post = lambda o: jnp.transpose(o.reshape(L, B, D), (1, 0, 2))

    # Try single-buffered grid-invariant blocks first; fall back to default
    # double-buffering if pl.Buffered(1) is not supported by this runtime.
    last_err = None
    for single_buffer in (True, False):
        try:
            return post(build(single_buffer)(*args))
        except Exception as e:  # fallback path; re-raised below if both fail
            last_err = e
    raise last_err


# --------------------------------------------------------------------------- #
# Self-test
# --------------------------------------------------------------------------- #
if __name__ == "__main__":
    def init_params(key, L, D):
        k_attn, k_w, k_b = jax.random.split(key, 3)
        # xavier_uniform_ on (1, L, L): bound = sqrt(6 / (L + L))
        xav = math.sqrt(6.0 / (L + L))
        attention = jax.random.uniform(k_attn, (1, L, L), jnp.float32,
                                       minval=-xav, maxval=xav)
        # nn.Linear(D, D) default init: uniform(-1/sqrt(D), 1/sqrt(D))
        wb = 1.0 / math.sqrt(D)
        w = jax.random.uniform(k_w, (D, D), jnp.float32, minval=-wb, maxval=wb)
        b = jax.random.uniform(k_b, (D,), jnp.float32, minval=-wb, maxval=wb)
        return attention, w, b

    def reference(x, attention, w, b):
        value = jnp.einsum("bld,ed->ble", x, w) + b
        return jnp.matmul(jax.nn.softmax(attention, axis=-1), value)

    key = jax.random.PRNGKey(0)
    # Primary shape exercises the lane-folded path (D < 128); the secondary
    # shape exercises the transpose-free native-layout path (D % 128 == 0).
    for (B, L, D) in [(2, 8, 32), (2, 8, 128)]:
        key, kp, kx = jax.random.split(key, 3)
        attention, w, b = init_params(kp, L, D)
        x = jax.random.normal(kx, (B, L, D), jnp.float32)

        out = jax.block_until_ready(synthesizer_random(x, attention, w, b))
        ref = reference(x, attention, w, b)

        assert out.shape == (B, L, D)
        assert jnp.allclose(out, ref, atol=1e-4, rtol=1e-4), \
            f"mismatch vs reference at shape {(B, L, D)}"

    print("KERNEL_OK")
</pallas_src>

<mosaic_0001>
module attributes {stable_mosaic.version = 11 : i64} {
  func.func @_synth_kernel_folded(%arg0: i32, %arg1: memref<8x8xf32, #tpu.memory_space<vmem>>, %arg2: memref<32x32xf32, #tpu.memory_space<vmem>>, %arg3: memref<1x64xf32, #tpu.memory_space<vmem>>, %arg4: memref<8x64xf32, #tpu.memory_space<vmem>>, %arg5: memref<8x64xf32, #tpu.memory_space<vmem>>, %arg6: memref<8x64xf32, #tpu.memory_space<vmem>>) attributes {dimension_semantics = [#tpu.dimension_semantics<parallel>], iteration_bounds = array<i64: 1>, scalar_prefetch = 0 : i64, scratch_operands = 1 : i64, tpu.core_type = #tpu.core_type<tc>, window_params = [{pipeline_mode = #tpu.pipeline_mode<synchronous>, transform_indices = @transform_0, window_bounds = array<i64: 8, 8>}, {pipeline_mode = #tpu.pipeline_mode<synchronous>, transform_indices = @transform_1, window_bounds = array<i64: 32, 32>}, {pipeline_mode = #tpu.pipeline_mode<synchronous>, transform_indices = @transform_2, window_bounds = array<i64: 1, 64>}, {transform_indices = @transform_3, window_bounds = array<i64: 8, 64>}, {transform_indices = @transform_4, window_bounds = array<i64: 8, 64>}]} {
    %c0 = arith.constant 0 : index
    %c0_0 = arith.constant 0 : index
    %0 = vector.load %arg2[%c0, %c0_0] : memref<32x32xf32, #tpu.memory_space<vmem>>, vector<32x32xf32>
    %c0_1 = arith.constant 0 : index
    %c0_2 = arith.constant 0 : index
    %1 = vector.load %arg4[%c0_1, %c0_2] : memref<8x64xf32, #tpu.memory_space<vmem>>, vector<8x32xf32>
    %cst = arith.constant dense<0.000000e+00> : vector<8x32xf32>
    %2 = tpu.matmul %1, %0, %cst {dimension_numbers = #tpu.dot_dimension_numbers<[1], [0], [0], [1], [0, 0, 1, 1], [], []>} : vector<8x32xf32>, vector<32x32xf32>, vector<8x32xf32> -> vector<8x32xf32>
    %c0_3 = arith.constant 0 : index
    %c0_4 = arith.constant 0 : index
    %3 = vector.load %arg6[%c0_3, %c0_4] : memref<8x64xf32, #tpu.memory_space<vmem>>, vector<8x32xf32>
    tpu.vector_store %arg6[%c0_3, %c0_4], %2 {strides = array<i32>} : memref<8x64xf32, #tpu.memory_space<vmem>>, vector<8x32xf32>,
    %c0_5 = arith.constant 0 : index
    %c32 = arith.constant 32 : index
    %4 = vector.load %arg4[%c0_5, %c32] : memref<8x64xf32, #tpu.memory_space<vmem>>, vector<8x32xf32>
    %cst_6 = arith.constant dense<0.000000e+00> : vector<8x32xf32>
    %5 = tpu.matmul %4, %0, %cst_6 {dimension_numbers = #tpu.dot_dimension_numbers<[1], [0], [0], [1], [0, 0, 1, 1], [], []>} : vector<8x32xf32>, vector<32x32xf32>, vector<8x32xf32> -> vector<8x32xf32>
    %c0_7 = arith.constant 0 : index
    %c32_8 = arith.constant 32 : index
    %6 = vector.load %arg6[%c0_7, %c32_8] : memref<8x64xf32, #tpu.memory_space<vmem>>, vector<8x32xf32>
    tpu.vector_store %arg6[%c0_7, %c32_8], %5 {strides = array<i32>} : memref<8x64xf32, #tpu.memory_space<vmem>>, vector<8x32xf32>,
    %c0_9 = arith.constant 0 : index
    %c0_10 = arith.constant 0 : index
    %7 = vector.load %arg1[%c0_9, %c0_10] : memref<8x8xf32, #tpu.memory_space<vmem>>, vector<8x8xf32>
    %c0_11 = arith.constant 0 : index
    %c0_12 = arith.constant 0 : index
    %8 = vector.load %arg6[%c0_11, %c0_12] : memref<8x64xf32, #tpu.memory_space<vmem>>, vector<8x64xf32>
    %cst_13 = arith.constant dense<0.000000e+00> : vector<8x64xf32>
    %9 = tpu.matmul %7, %8, %cst_13 {dimension_numbers = #tpu.dot_dimension_numbers<[1], [0], [0], [1], [0, 0, 1, 1], [], []>} : vector<8x8xf32>, vector<8x64xf32>, vector<8x64xf32> -> vector<8x64xf32>
    %c0_14 = arith.constant 0 : index
    %c0_15 = arith.constant 0 : index
    %10 = vector.load %arg3[%c0_14, %c0_15] : memref<1x64xf32, #tpu.memory_space<vmem>>, vector<1x64xf32>
    %11 = vector.broadcast %10 : vector<1x64xf32> to vector<8x64xf32>
    %12 = arith.addf %9, %11 : vector<8x64xf32>
    %c0_16 = arith.constant 0 : index
    %c0_17 = arith.constant 0 : index
    %13 = vector.load %arg5[%c0_16, %c0_17] : memref<8x64xf32, #tpu.memory_space<vmem>>, vector<8x64xf32>
    tpu.vector_store %arg5[%c0_16, %c0_17], %12 {strides = array<i32>} : memref<8x64xf32, #tpu.memory_space<vmem>>, vector<8x64xf32>,
    return
  }
  func.func @transform_0(%arg0: i32) -> (i32, i32) {
    %c0_i32 = arith.constant 0 : i32
    %c0_i32_0 = arith.constant 0 : i32
    %c0_i32_1 = arith.constant 0 : i32
    return %c0_i32, %c0_i32_0 : i32, i32
  }
  func.func @transform_1(%arg0: i32) -> (i32, i32) {
    %c0_i32 = arith.constant 0 : i32
    %c0_i32_0 = arith.constant 0 : i32
    %c0_i32_1 = arith.constant 0 : i32
    return %c0_i32, %c0_i32_0 : i32, i32
  }
  func.func @transform_2(%arg0: i32) -> (i32, i32) {
    %c0_i32 = arith.constant 0 : i32
    %c0_i32_0 = arith.constant 0 : i32
    %c0_i32_1 = arith.constant 0 : i32
    return %c0_i32, %c0_i32_0 : i32, i32
  }
  func.func @transform_3(%arg0: i32) -> (i32, i32) {
    %c0_i32 = arith.constant 0 : i32
    %c0_i32_0 = arith.constant 0 : i32
    return %c0_i32, %arg0 : i32, i32
  }
  func.func @transform_4(%arg0: i32) -> (i32, i32) {
    %c0_i32 = arith.constant 0 : i32
    %c0_i32_0 = arith.constant 0 : i32
    return %c0_i32, %arg0 : i32, i32
  }
}

module attributes {stable_mosaic.version = 11 : i64} {
  func.func @_synth_kernel_folded(%arg0: i32, %arg1: memref<8x8xf32, #tpu.memory_space<vmem>>, %arg2: memref<32x32xf32, #tpu.memory_space<vmem>>, %arg3: memref<1x64xf32, #tpu.memory_space<vmem>>, %arg4: memref<8x64xf32, #tpu.memory_space<vmem>>, %arg5: memref<8x64xf32, #tpu.memory_space<vmem>>, %arg6: memref<8x64xf32, #tpu.memory_space<vmem>>) attributes {dimension_semantics = [#tpu.dimension_semantics<parallel>], iteration_bounds = array<i64: 1>, scalar_prefetch = 0 : i64, scratch_operands = 1 : i64, tpu.core_type = #tpu.core_type<tc>, window_params = [{pipeline_mode = #tpu.pipeline_mode<synchronous>, transform_indices = @transform_0, window_bounds = array<i64: 8, 8>}, {pipeline_mode = #tpu.pipeline_mode<synchronous>, transform_indices = @transform_1, window_bounds = array<i64: 32, 32>}, {pipeline_mode = #tpu.pipeline_mode<synchronous>, transform_indices = @transform_2, window_bounds = array<i64: 1, 64>}, {transform_indices = @transform_3, window_bounds = array<i64: 8, 64>}, {transform_indices = @transform_4, window_bounds = array<i64: 8, 64>}]} {
    %c0 = arith.constant 0 : index
    %c0_0 = arith.constant 0 : index
    %0 = vector.load %arg2[%c0, %c0_0] : memref<32x32xf32, #tpu.memory_space<vmem>>, vector<32x32xf32>
    %c0_1 = arith.constant 0 : index
    %c0_2 = arith.constant 0 : index
    %1 = vector.load %arg4[%c0_1, %c0_2] : memref<8x64xf32, #tpu.memory_space<vmem>>, vector<8x32xf32>
    %cst = arith.constant dense<0.000000e+00> : vector<8x32xf32>
    %2 = tpu.matmul %1, %0, %cst {dimension_numbers = #tpu.dot_dimension_numbers<[1], [0], [0], [1], [0, 0, 1, 1], [], []>} : vector<8x32xf32>, vector<32x32xf32>, vector<8x32xf32> -> vector<8x32xf32>
    %c0_3 = arith.constant 0 : index
    %c0_4 = arith.constant 0 : index
    %3 = vector.load %arg6[%c0_3, %c0_4] : memref<8x64xf32, #tpu.memory_space<vmem>>, vector<8x32xf32>
    tpu.vector_store %arg6[%c0_3, %c0_4], %2 {strides = array<i32>} : memref<8x64xf32, #tpu.memory_space<vmem>>, vector<8x32xf32>,
    %c0_5 = arith.constant 0 : index
    %c32 = arith.constant 32 : index
    %4 = vector.load %arg4[%c0_5, %c32] : memref<8x64xf32, #tpu.memory_space<vmem>>, vector<8x32xf32>
    %cst_6 = arith.constant dense<0.000000e+00> : vector<8x32xf32>
    %5 = tpu.matmul %4, %0, %cst_6 {dimension_numbers = #tpu.dot_dimension_numbers<[1], [0], [0], [1], [0, 0, 1, 1], [], []>} : vector<8x32xf32>, vector<32x32xf32>, vector<8x32xf32> -> vector<8x32xf32>
    %c0_7 = arith.constant 0 : index
    %c32_8 = arith.constant 32 : index
    %6 = vector.load %arg6[%c0_7, %c32_8] : memref<8x64xf32, #tpu.memory_space<vmem>>, vector<8x32xf32>
    tpu.vector_store %arg6[%c0_7, %c32_8], %5 {strides = array<i32>} : memref<8x64xf32, #tpu.memory_space<vmem>>, vector<8x32xf32>,
    %c0_9 = arith.constant 0 : index
    %c0_10 = arith.constant 0 : index
    %7 = vector.load %arg1[%c0_9, %c0_10] : memref<8x8xf32, #tpu.memory_space<vmem>>, vector<8x8xf32>
    %c0_11 = arith.constant 0 : index
    %c0_12 = arith.constant 0 : index
    %8 = vector.load %arg6[%c0_11, %c0_12] : memref<8x64xf32, #tpu.memory_space<vmem>>, vector<8x64xf32>
    %cst_13 = arith.constant dense<0.000000e+00> : vector<8x64xf32>
    %9 = tpu.matmul %7, %8, %cst_13 {dimension_numbers = #tpu.dot_dimension_numbers<[1], [0], [0], [1], [0, 0, 1, 1], [], []>} : vector<8x8xf32>, vector<8x64xf32>, vector<8x64xf32> -> vector<8x64xf32>
    %c0_14 = arith.constant 0 : index
    %c0_15 = arith.constant 0 : index
    %10 = vector.load %arg3[%c0_14, %c0_15] : memref<1x64xf32, #tpu.memory_space<vmem>>, vector<1x64xf32>
    %11 = vector.broadcast %10 : vector<1x64xf32> to vector<8x64xf32>
    %12 = arith.addf %9, %11 : vector<8x64xf32>
    %c0_16 = arith.constant 0 : index
    %c0_17 = arith.constant 0 : index
    %13 = vector.load %arg5[%c0_16, %c0_17] : memref<8x64xf32, #tpu.memory_space<vmem>>, vector<8x64xf32>
    tpu.vector_store %arg5[%c0_16, %c0_17], %12 {strides = array<i32>} : memref<8x64xf32, #tpu.memory_space<vmem>>, vector<8x64xf32>,
    return
  }
  func.func @transform_0(%arg0: i32) -> (i32, i32) {
    %c0_i32 = arith.constant 0 : i32
    %c0_i32_0 = arith.constant 0 : i32
    %c0_i32_1 = arith.constant 0 : i32
    return %c0_i32, %c0_i32_0 : i32, i32
  }
  func.func @transform_1(%arg0: i32) -> (i32, i32) {
    %c0_i32 = arith.constant 0 : i32
    %c0_i32_0 = arith.constant 0 : i32
    %c0_i32_1 = arith.constant 0 : i32
    return %c0_i32, %c0_i32_0 : i32, i32
  }
  func.func @transform_2(%arg0: i32) -> (i32, i32) {
    %c0_i32 = arith.constant 0 : i32
    %c0_i32_0 = arith.constant 0 : i32
    %c0_i32_1 = arith.constant 0 : i32
    return %c0_i32, %c0_i32_0 : i32, i32
  }
  func.func @transform_3(%arg0: i32) -> (i32, i32) {
    %c0_i32 = arith.constant 0 : i32
    %c0_i32_0 = arith.constant 0 : i32
    return %c0_i32, %arg0 : i32, i32
  }
  func.func @transform_4(%arg0: i32) -> (i32, i32) {
    %c0_i32 = arith.constant 0 : i32
    %c0_i32_0 = arith.constant 0 : i32
    return %c0_i32, %arg0 : i32, i32
  }
}

</mosaic_0001>

<bundles_post_ra>
// kernel: tpu_custom_call.1
= control target key start
LH: loop header
LB: loop body
LE: loop exit
PB: predicated region body
PF: predicated region fallthrough
CT: control target
= control target key end

     0   :  { %9 = vsyncpa [#allocation4], 0  ;;  %s531_s0 = inlined_call_operand.hbm [shape: f32[8,8], index: 0, kind: input, shape index: {}]   ;;  %s532_s1 = inlined_call_operand.hbm [shape: f32[32,32], index: 1, kind: input, shape index: {}]   ;;  %s533_s2 = inlined_call_operand.vmem [shape: f32[1,64], index: 2, kind: input, shape index: {}]   ;;  %s534_s3 = inlined_call_operand.vmem [shape: f32[8,64], index: 3, kind: input, shape index: {}]   ;;  %s535_s4 = inlined_call_operand.hbm [shape: f32[8,64], index: 4, kind: output, shape index: {}]  }
   0x1   :  { %10 = vsyncpa [#allocation7], 0 }
   0x2   :  { %11 = vsyncpa [#allocation5], 0  ;;  %s444_s15 = smov [#allocation3]   ;;  %s445_s17 = smov [#allocation6]  }
   0x3   :  { %s18_s16 = sshll.u32 %s444_s15, 4  ;;  %s27_s18 = sshll.u32 %s445_s17, 4  ;;  %s19_s16 = int_to_ptr.vmem [resolvable:$true] %s18_s16  ;;  %s479_s18 = int_to_ptr.vmem [resolvable:$true] %s27_s18 }
   0x4   :  { %s372_s21 = scalar_lea.hbm %s531_s0, 128 }
   0x5   :  { %p373_p0 = scmp.ne.s32.totalorder %s531_s0, %s372_s21  ;;  %p376_p1 = scmp.lt.u32.totalorder %s372_s21, %s531_s0 }
   0x7   :  { %p378_p2 = pnand %p376_p1, %p373_p0 }
   0x9   :  { %381 = shalt.err (!%p378_p2)
}
   0xa   :  { %s382_s26 = scalar_lea.vmem %s19_s16, 128  ;;  %p387_p4 = scmp.lt.s32.totalorder %s19_s16, %s19_s16 }
   0xb   :  { %p383_p3 = scmp.ne.s32.totalorder %s19_s16, %s382_s26  ;;  %p388_p5 = scmp.lt.s32.totalorder %s382_s26, %s382_s26 }
   0xd   :  { %p389_p6 = por %p388_p5, %p387_p4 }
   0xf   :  { %p390_p7 = pnand %p389_p6, %p383_p3 }
  0x11   :  { %393 = shalt.err (!%p390_p7)
}
  0x12   :  { %21 = dma.hbm_to_vmem [thread:$0]  %s531_s0, 128, %s19_s16, [#allocation4]  }
  0x13   :  { %s394_s5 = scalar_lea.hbm %s532_s1, 512 }
  0x14   :  { %p395_p8 = scmp.ne.s32.totalorder %s532_s1, %s394_s5  ;;  %p398_p9 = scmp.lt.u32.totalorder %s394_s5, %s532_s1 }
  0x16   :  { %p400_p10 = pnand %p398_p9, %p395_p8 }
  0x18   :  { %403 = shalt.err (!%p400_p10)
}
  0x19   :  { %s404_s10 = scalar_lea.vmem %s479_s18, 512  ;;  %p409_p12 = scmp.lt.s32.totalorder %s479_s18, %s479_s18 }
  0x1a   :  { %p405_p11 = scmp.ne.s32.totalorder %s479_s18, %s404_s10  ;;  %p410_p13 = scmp.lt.s32.totalorder %s404_s10, %s404_s10 }
  0x1c   :  { %p411_p0 = por %p410_p13, %p409_p12 }
  0x1e   :  { %p412_p1 = pnand %p411_p0, %p405_p11 }
  0x20   :  { %415 = shalt.err (!%p412_p1)
}
  0x21   :  { %s446_s0 = smov 128   ;;  %s447_s11 = smov 8  }
  0x22   :  { %33 = dma.hbm_to_vmem [thread:$0]  %s532_s1, 512, %s479_s18, [#allocation7], %s446_s0, %s446_s0, %s447_s11  }
  0x23   :  { %438 = dma.done.wait [#allocation4], 128  }
  0x24   :  { %439 = vsyncadd [#allocation4], 4294967168 }
  0x25   :  { %440 = dma.done.wait [#allocation7], 512  }
  0x26   :  { %441 = vsyncadd [#allocation7], 4294966784  ;;  %v448_v0 = vmov 0.0|0.0   ;;  %vm449_vm0 = vmmov 0   ;;  %v450_v1 = vmov 0.0   ;;  %v124_v2 = vld [vmem:[%s534_s3] sm:$0xff] }
  0x27   :  { %356 = vmatprep.subr.bf16.mxu1 %v448_v0  ;;  %342 = vmatprep.mubr.msk.f32.mxu1 %vm449_vm0, %v450_v1  ;;  %v44_v3 = vld [vmem:[#allocation6] sm:$0xff]  ;;  %v45_v4 = vld [vmem:[#allocation6 + $0x8] sm:$0xff]  ;;  %s451_s1 = smov 96   ;;  %v46_v6 = vld [vmem:[#allocation6 + $0x10] sm:$0xff]  ;;  %vm49_vm1 = vcmask 261120   ;;  %s452_s3 = smov 32  }
  0x28   :  { %350 = vmatprep.subr.bf16.mxu0 %v448_v0  ;;  %331 = vmatprep.mubr.msk.f32.mxu0 %vm449_vm0, %v450_v1  ;;  %v351_v5 = vpack.c.bf16 %v45_v4, %v44_v3  ;;  %v47_v7 = vld [vmem:[#allocation6 + $0x18] sm:$0xff]  ;;  %vm204_vm2 = vcmask 523520   ;;  %vm215_vm3 = vcmask 64512   ;;  %v309_v17 = vld [vmem:[%s533_s2] ss:$0 sm:$0xff]  ;;  %s453_s18 = smov [#allocation8]  }
  0x29   :  { %126 = vrot.lane.b32.xlu0 %v124_v2, %s451_s1  ;;  %v354_v8 = vpack.c.bf16 %v47_v7, %v46_v6  ;;  %v206_v15 = vld [vmem:[#allocation3] sm:$0xff]  ;;  %s297_s19 = sshll.u32 %s453_s18, 4  ;;  %vm289_vm4 = vcmask 523264   ;;  %s298_s19 = int_to_ptr.vmem [resolvable:$true] %s297_s19 }
  0x2a   :  { %358 = vmatpush3.bf16.msra.mxu1 %v351_v5  ;;  %352 = vmatpush3.bf16.msra.mxu0 %v351_v5  ;;  %s416_s20 = scalar_lea.vmem %s298_s19, 128  ;;  %p421_p3 = scmp.lt.s32.totalorder %s298_s19, %s298_s19 }
  0x2b   :  { %359 = vmatprep.subr.bf16.mxu1 %v448_v0  ;;  %353 = vmatprep.subr.bf16.mxu0 %v448_v0  ;;  %p417_p2 = scmp.ne.s32.totalorder %s298_s19, %s416_s20  ;;  %p422_p4 = scmp.lt.s32.totalorder %s416_s20, %s416_s20 }
  0x2d   :  { %p423_p5 = por %p422_p4, %p421_p3 }
  0x2e   :  { %361 = vmatpush3.bf16.msra.mxu1 %v354_v8  ;;  %355 = vmatpush3.bf16.msra.mxu0 %v354_v8 }
  0x2f   :  { %345 = vmatprep.subr.mxu0 %v450_v1  ;;  %p424_p6 = pnand %p423_p5, %p417_p2 }
  0x31   :  { %332 = vmatmul.mubr.msk.f32.vlgmr.msra.gmra.mrb[0].mxu0 %vm49_vm1, %v124_v2 }
  0x32   :  { %347 = vmatprep.mubr.msk.f32.mxu0 %vm449_vm0, %v450_v1 }
  0x9b   :  { %v127_v9 = vpop.permute.xlu0 %126 }
  0x9c   :  { %343 = vmatmul.mubr.msk.f32.vlgmr.msra.gmra.mrb[0].mxu1 %vm49_vm1, %v127_v9 }
 0x104   :  { %v119_v10 = vpop.f32.mrb[0].mxu0 }
 0x105   :  { %123 = vst.msk [vmem:[#allocation2] sm:$0xff] %vm49_vm1, %v119_v10  ;;  %v333_v11 = vpop.f32.mrb[1].mxu0 }
 0x16f   :  { %v196_v12 = vpop.f32.mrb[0].mxu1 }
 0x170   :  { %201 = vrot.lane.b32.xlu0 %v196_v12, %s452_s3  ;;  %v344_v13 = vpop.f32.mrb[1].mxu1 }
 0x1e2   :  { %v202_v14 = vpop.permute.xlu0 %201 }
 0x1e3   :  { %205 = vst.msk [vmem:[#allocation2] sm:$0xff] %vm204_vm2, %v202_v14 }
 0x1ea   :  { %v207_v16 = vld [vmem:[#allocation2] sm:$0xff] }
 0x1eb   :  { %346 = vmatpush3.msra.mxu0 %v207_v16 }
 0x1ec   :  { %348 = vmatmul.mubr.msk.f32.vlgmr.msra.gmra.mrb[2].mxu0 %vm215_vm3, %v206_v15 }
 0x2bf   :  { %v285_v18 = vpop.f32.mrb[2].mxu0 }
 0x2c0   :  { %v286_v19 = vadd.f32 %v309_v17, %v285_v18  ;;  %v349_v20 = vpop.f32.mrb[3].mxu0 }
 0x2c2   :  { %290 = vst.msk [vmem:[#allocation8] sm:$0xff] %vm289_vm4, %v286_v19 }
 0x2c3   :  { %427 = shalt.err (!%p424_p6)
}
 0x2c4   :  { %s428_s23 = scalar_lea.hbm %s535_s4, 128 }
 0x2c5   :  { %p429_p7 = scmp.ne.s32.totalorder %s535_s4, %s428_s23  ;;  %p432_p8 = scmp.lt.u32.totalorder %s428_s23, %s535_s4 }
 0x2c7   :  { %p434_p9 = pnand %p432_p8, %p429_p7 }
 0x2c9   :  { %437 = shalt.err (!%p434_p9)
}
 0x2ca   :  { %300 = dma.vmem_to_hbm [thread:$0]  %s298_s19, 128, %s535_s4, [#allocation5]  }
 0x2cb   :  { %442 = dma.done.wait [#allocation5], 128  }
 0x2cc   :  { %443 = vsyncadd [#allocation5], 4294967168 }
 0x2cd   :  { %304 = vsyncpa [#allocation4], 1 }
 0x2ce   :  { %305 = vsyncpa [#allocation7], 1 }
 0x2cf   :  { %306 = vsyncpa [#allocation5], 1 }

// kernel: tpu_custom_call.1
= control target key start
LH: loop header
LB: loop body
LE: loop exit
PB: predicated region body
PF: predicated region fallthrough
CT: control target
= control target key end

     0   :  { %9 = vsyncpa [#allocation4], 0  ;;  %s531_s0 = inlined_call_operand.hbm [shape: f32[8,8], index: 0, kind: input, shape index: {}]   ;;  %s532_s1 = inlined_call_operand.hbm [shape: f32[32,32], index: 1, kind: input, shape index: {}]   ;;  %s533_s2 = inlined_call_operand.vmem [shape: f32[1,64], index: 2, kind: input, shape index: {}]   ;;  %s534_s3 = inlined_call_operand.vmem [shape: f32[8,64], index: 3, kind: input, shape index: {}]   ;;  %s535_s4 = inlined_call_operand.hbm [shape: f32[8,64], index: 4, kind: output, shape index: {}]  }
   0x1   :  { %10 = vsyncpa [#allocation7], 0 }
   0x2   :  { %11 = vsyncpa [#allocation5], 0  ;;  %s444_s15 = smov [#allocation3]   ;;  %s445_s17 = smov [#allocation6]  }
   0x3   :  { %s18_s16 = sshll.u32 %s444_s15, 4  ;;  %s27_s18 = sshll.u32 %s445_s17, 4  ;;  %s19_s16 = int_to_ptr.vmem [resolvable:$true] %s18_s16  ;;  %s479_s18 = int_to_ptr.vmem [resolvable:$true] %s27_s18 }
   0x4   :  { %s372_s21 = scalar_lea.hbm %s531_s0, 128 }
   0x5   :  { %p373_p0 = scmp.ne.s32.totalorder %s531_s0, %s372_s21  ;;  %p376_p1 = scmp.lt.u32.totalorder %s372_s21, %s531_s0 }
   0x7   :  { %p378_p2 = pnand %p376_p1, %p373_p0 }
   0x9   :  { %381 = shalt.err (!%p378_p2)
}
   0xa   :  { %s382_s26 = scalar_lea.vmem %s19_s16, 128  ;;  %p387_p4 = scmp.lt.s32.totalorder %s19_s16, %s19_s16 }
   0xb   :  { %p383_p3 = scmp.ne.s32.totalorder %s19_s16, %s382_s26  ;;  %p388_p5 = scmp.lt.s32.totalorder %s382_s26, %s382_s26 }
   0xd   :  { %p389_p6 = por %p388_p5, %p387_p4 }
   0xf   :  { %p390_p7 = pnand %p389_p6, %p383_p3 }
  0x11   :  { %393 = shalt.err (!%p390_p7)
}
  0x12   :  { %21 = dma.hbm_to_vmem [thread:$0]  %s531_s0, 128, %s19_s16, [#allocation4]  }
  0x13   :  { %s394_s5 = scalar_lea.hbm %s532_s1, 512 }
  0x14   :  { %p395_p8 = scmp.ne.s32.totalorder %s532_s1, %s394_s5  ;;  %p398_p9 = scmp.lt.u32.totalorder %s394_s5, %s532_s1 }
  0x16   :  { %p400_p10 = pnand %p398_p9, %p395_p8 }
  0x18   :  { %403 = shalt.err (!%p400_p10)
}
  0x19   :  { %s404_s10 = scalar_lea.vmem %s479_s18, 512  ;;  %p409_p12 = scmp.lt.s32.totalorder %s479_s18, %s479_s18 }
  0x1a   :  { %p405_p11 = scmp.ne.s32.totalorder %s479_s18, %s404_s10  ;;  %p410_p13 = scmp.lt.s32.totalorder %s404_s10, %s404_s10 }
  0x1c   :  { %p411_p0 = por %p410_p13, %p409_p12 }
  0x1e   :  { %p412_p1 = pnand %p411_p0, %p405_p11 }
  0x20   :  { %415 = shalt.err (!%p412_p1)
}
  0x21   :  { %s446_s0 = smov 128   ;;  %s447_s11 = smov 8  }
  0x22   :  { %33 = dma.hbm_to_vmem [thread:$0]  %s532_s1, 512, %s479_s18, [#allocation7], %s446_s0, %s446_s0, %s447_s11  }
  0x23   :  { %438 = dma.done.wait [#allocation4], 128  }
  0x24   :  { %439 = vsyncadd [#allocation4], 4294967168 }
  0x25   :  { %440 = dma.done.wait [#allocation7], 512  }
  0x26   :  { %441 = vsyncadd [#allocation7], 4294966784  ;;  %v448_v0 = vmov 0.0|0.0   ;;  %vm449_vm0 = vmmov 0   ;;  %v450_v1 = vmov 0.0   ;;  %v124_v2 = vld [vmem:[%s534_s3] sm:$0xff] }
  0x27   :  { %356 = vmatprep.subr.bf16.mxu1 %v448_v0  ;;  %342 = vmatprep.mubr.msk.f32.mxu1 %vm449_vm0, %v450_v1  ;;  %v44_v3 = vld [vmem:[#allocation6] sm:$0xff]  ;;  %v45_v4 = vld [vmem:[#allocation6 + $0x8] sm:$0xff]  ;;  %s451_s1 = smov 96   ;;  %v46_v6 = vld [vmem:[#allocation6 + $0x10] sm:$0xff]  ;;  %vm49_vm1 = vcmask 261120   ;;  %s452_s3 = smov 32  }
  0x28   :  { %350 = vmatprep.subr.bf16.mxu0 %v448_v0  ;;  %331 = vmatprep.mubr.msk.f32.mxu0 %vm449_vm0, %v450_v1  ;;  %v351_v5 = vpack.c.bf16 %v45_v4, %v44_v3  ;;  %v47_v7 = vld [vmem:[#allocation6 + $0x18] sm:$0xff]  ;;  %vm204_vm2 = vcmask 523520   ;;  %vm215_vm3 = vcmask 64512   ;;  %v309_v17 = vld [vmem:[%s533_s2] ss:$0 sm:$0xff]  ;;  %s453_s18 = smov [#allocation8]  }
  0x29   :  { %126 = vrot.lane.b32.xlu0 %v124_v2, %s451_s1  ;;  %v354_v8 = vpack.c.bf16 %v47_v7, %v46_v6  ;;  %v206_v15 = vld [vmem:[#allocation3] sm:$0xff]  ;;  %s297_s19 = sshll.u32 %s453_s18, 4  ;;  %vm289_vm4 = vcmask 523264   ;;  %s298_s19 = int_to_ptr.vmem [resolvable:$true] %s297_s19 }
  0x2a   :  { %358 = vmatpush3.bf16.msra.mxu1 %v351_v5  ;;  %352 = vmatpush3.bf16.msra.mxu0 %v351_v5  ;;  %s416_s20 = scalar_lea.vmem %s298_s19, 128  ;;  %p421_p3 = scmp.lt.s32.totalorder %s298_s19, %s298_s19 }
  0x2b   :  { %359 = vmatprep.subr.bf16.mxu1 %v448_v0  ;;  %353 = vmatprep.subr.bf16.mxu0 %v448_v0  ;;  %p417_p2 = scmp.ne.s32.totalorder %s298_s19, %s416_s20  ;;  %p422_p4 = scmp.lt.s32.totalorder %s416_s20, %s416_s20 }
  0x2d   :  { %p423_p5 = por %p422_p4, %p421_p3 }
  0x2e   :  { %361 = vmatpush3.bf16.msra.mxu1 %v354_v8  ;;  %355 = vmatpush3.bf16.msra.mxu0 %v354_v8 }
  0x2f   :  { %345 = vmatprep.subr.mxu0 %v450_v1  ;;  %p424_p6 = pnand %p423_p5, %p417_p2 }
  0x31   :  { %332 = vmatmul.mubr.msk.f32.vlgmr.msra.gmra.mrb[0].mxu0 %vm49_vm1, %v124_v2 }
  0x32   :  { %347 = vmatprep.mubr.msk.f32.mxu0 %vm449_vm0, %v450_v1 }
  0x9b   :  { %v127_v9 = vpop.permute.xlu0 %126 }
  0x9c   :  { %343 = vmatmul.mubr.msk.f32.vlgmr.msra.gmra.mrb[0].mxu1 %vm49_vm1, %v127_v9 }
 0x104   :  { %v119_v10 = vpop.f32.mrb[0].mxu0 }
 0x105   :  { %123 = vst.msk [vmem:[#allocation2] sm:$0xff] %vm49_vm1, %v119_v10  ;;  %v333_v11 = vpop.f32.mrb[1].mxu0 }
 0x16f   :  { %v196_v12 = vpop.f32.mrb[0].mxu1 }
 0x170   :  { %201 = vrot.lane.b32.xlu0 %v196_v12, %s452_s3  ;;  %v344_v13 = vpop.f32.mrb[1].mxu1 }
 0x1e2   :  { %v202_v14 = vpop.permute.xlu0 %201 }
 0x1e3   :  { %205 = vst.msk [vmem:[#allocation2] sm:$0xff] %vm204_vm2, %v202_v14 }
 0x1ea   :  { %v207_v16 = vld [vmem:[#allocation2] sm:$0xff] }
 0x1eb   :  { %346 = vmatpush3.msra.mxu0 %v207_v16 }
 0x1ec   :  { %348 = vmatmul.mubr.msk.f32.vlgmr.msra.gmra.mrb[2].mxu0 %vm215_vm3, %v206_v15 }
 0x2bf   :  { %v285_v18 = vpop.f32.mrb[2].mxu0 }
 0x2c0   :  { %v286_v19 = vadd.f32 %v309_v17, %v285_v18  ;;  %v349_v20 = vpop.f32.mrb[3].mxu0 }
 0x2c2   :  { %290 = vst.msk [vmem:[#allocation8] sm:$0xff] %vm289_vm4, %v286_v19 }
 0x2c3   :  { %427 = shalt.err (!%p424_p6)
}
 0x2c4   :  { %s428_s23 = scalar_lea.hbm %s535_s4, 128 }
 0x2c5   :  { %p429_p7 = scmp.ne.s32.totalorder %s535_s4, %s428_s23  ;;  %p432_p8 = scmp.lt.u32.totalorder %s428_s23, %s535_s4 }
 0x2c7   :  { %p434_p9 = pnand %p432_p8, %p429_p7 }
 0x2c9   :  { %437 = shalt.err (!%p434_p9)
}
 0x2ca   :  { %300 = dma.vmem_to_hbm [thread:$0]  %s298_s19, 128, %s535_s4, [#allocation5]  }
 0x2cb   :  { %442 = dma.done.wait [#allocation5], 128  }
 0x2cc   :  { %443 = vsyncadd [#allocation5], 4294967168 }
 0x2cd   :  { %304 = vsyncpa [#allocation4], 1 }
 0x2ce   :  { %305 = vsyncpa [#allocation7], 1 }
 0x2cf   :  { %306 = vsyncpa [#allocation5], 1 }

</bundles_post_ra>
